<compile_context>
chip_gen: v6e
topology: v6e:2x2x1
jax: 0.10.0
libtpu: 0.0.40
codegen_flags: <defaults>
</compile_context>

<pallas_src>
import functools

import jax
import jax.numpy as jnp
from jax.experimental import pallas as pl
from jax.experimental.pallas import tpu as pltpu


def _round_up(a, b):
    return (a + b - 1) // b * b


def _adain_kernel(x_ref, w_ref, b_ref, o_ref, *, eps, row_tile, inv_n):
    # x_ref: (row_tile, HW_pad); w_ref / b_ref: resident (BC_pad, 1) float32.
    i = pl.program_id(0)
    row0 = pl.multiple_of(i * row_tile, 8)

    x = x_ref[...].astype(jnp.float32)

    # One-pass stats.  Padded columns/rows are zero-filled in the wrapper, so
    # summing the whole lane-dense block and dividing by the *real* spatial
    # size gives the exact mean and biased variance.
    s1 = jnp.sum(x, axis=-1, keepdims=True)
    s2 = jnp.sum(x * x, axis=-1, keepdims=True)
    mean = s1 * inv_n
    var = jnp.maximum(s2 * inv_n - mean * mean, 0.0)
    inv_std = jax.lax.rsqrt(var + eps)

    w = w_ref[pl.ds(row0, row_tile), :]        # (row_tile, 1)
    b = b_ref[pl.ds(row0, row_tile), :]        # (row_tile, 1)

    # Folded affine: 2 VALU ops per element.
    scale = w * inv_std
    shift = b - mean * scale
    o_ref[...] = (x * scale + shift).astype(o_ref.dtype)


def adaptive_instance_norm_2d(x, weight, bias, *, eps=1e-5):
    """x: (B, C, H, W); weight, bias: (B*C,). Returns (B, C, H, W)."""
    B, C, H, W = x.shape
    BC = B * C
    HW = H * W
    assert weight.shape == (BC,) and bias.shape == (BC,)

    itemsize = jnp.dtype(x.dtype).itemsize
    pack = max(8, 32 // itemsize)          # sublane pack: 8 for f32, 16 for bf16
    HW_pad = _round_up(HW, 128)            # lane-dense output slab

    # VMEM budget for the pipelined blocks (2x in + 2x out in x.dtype) plus
    # in-kernel f32 temporaries.  Sized conservatively so it fits v7x's
    # 64 MiB physical VMEM as well as v5e/v6e.
    vmem_budget = 24 * 1024 * 1024
    per_row_bytes = HW_pad * (4 * itemsize + 8)
    max_rows = max(pack, (vmem_budget // per_row_bytes) // pack * pack)
    # TODO(synk): very large spatial extents (where even a pack-row block
    # exceeds the budget, e.g. 1024x1024 f32) would need an HW reduction grid
    # axis with a two-phase sum/sumsq scheme; not implemented here.

    if BC <= pack:
        row_tile = pack
    else:
        # Biggest tile within budget, but keep >= 2 grid steps so the single
        # "parallel" axis can be sharded across both TensorCores on v7x.
        row_tile = min(max_rows, _round_up(pl.cdiv(BC, 2), pack), 1024)

    BC_pad = _round_up(BC, row_tile)
    grid = (BC_pad // row_tile,)

    x2 = x.reshape(BC, HW)
    w2 = weight.astype(jnp.float32).reshape(BC, 1)
    b2 = bias.astype(jnp.float32).reshape(BC, 1)
    if BC_pad != BC or HW_pad != HW:
        x2 = jnp.pad(x2, ((0, BC_pad - BC), (0, HW_pad - HW)))
    if BC_pad != BC:
        w2 = jnp.pad(w2, ((0, BC_pad - BC), (0, 0)))
        b2 = jnp.pad(b2, ((0, BC_pad - BC), (0, 0)))

    kernel = functools.partial(
        _adain_kernel, eps=float(eps), row_tile=row_tile, inv_n=1.0 / float(HW)
    )

    out2 = pl.pallas_call(
        kernel,
        out_shape=jax.ShapeDtypeStruct((BC_pad, HW_pad), x.dtype),
        grid_spec=pltpu.PrefetchScalarGridSpec(
            num_scalar_prefetch=0,
            grid=grid,
            in_specs=[
                pl.BlockSpec((row_tile, HW_pad), lambda i: (i, 0)),
                pl.BlockSpec((BC_pad, 1), lambda i: (0, 0)),   # resident weight
                pl.BlockSpec((BC_pad, 1), lambda i: (0, 0)),   # resident bias
            ],
            out_specs=pl.BlockSpec((row_tile, HW_pad), lambda i: (i, 0)),
        ),
        compiler_params=pltpu.CompilerParams(
            dimension_semantics=("parallel",),
            vmem_limit_bytes=48 * 1024 * 1024,
        ),
    )(x2, w2, b2)

    if BC_pad != BC or HW_pad != HW:
        out2 = out2[:BC, :HW]
    return out2.reshape(B, C, H, W)


def _reference(x, weight, bias, eps=1e-5):
    """Pure-JAX reference matching F.batch_norm on (1, B*C, H, W), training=True."""
    B, C, H, W = x.shape
    xr = x.reshape(B * C, H * W).astype(jnp.float32)
    mean = xr.mean(axis=1, keepdims=True)
    var = ((xr - mean) ** 2).mean(axis=1, keepdims=True)
    y = (xr - mean) / jnp.sqrt(var + eps) * weight[:, None] + bias[:, None]
    return y.reshape(B, C, H, W).astype(x.dtype)


if __name__ == "__main__":
    B, C, H, W = 2, 4, 16, 16
    key = jax.random.PRNGKey(0)
    kx, kw, kb = jax.random.split(key, 3)

    x = jax.random.normal(kx, (B, C, H, W), dtype=jnp.float32)
    # AdaIN weight/bias are assigned externally (shape B*C).
    weight = jax.random.normal(kw, (B * C,), dtype=jnp.float32) * 0.5 + 1.0
    bias = jax.random.normal(kb, (B * C,), dtype=jnp.float32) * 0.1
    # TODO(synk): running_mean/running_var momentum EMA updates are stateful
    # bookkeeping that do not affect the training-mode forward output; they
    # are not reproduced here.

    out = adaptive_instance_norm_2d(x, weight, bias, eps=1e-5)
    out = jax.block_until_ready(out)

    ref = _reference(x, weight, bias, eps=1e-5)
    assert out.shape == (B, C, H, W)
    assert jnp.allclose(out, ref, atol=1e-4, rtol=1e-4), (
        f"max abs err {jnp.max(jnp.abs(out - ref))}"
    )
    print("KERNEL_OK")
</pallas_src>

<mosaic_0001>
module attributes {stable_mosaic.version = 11 : i64} {
  func.func @_adain_kernel(%arg0: i32, %arg1: memref<8x256xf32, #tpu.memory_space<vmem>>, %arg2: memref<8x1xf32, #tpu.memory_space<vmem>>, %arg3: memref<8x1xf32, #tpu.memory_space<vmem>>, %arg4: memref<8x256xf32, #tpu.memory_space<vmem>>) attributes {dimension_semantics = [#tpu.dimension_semantics<parallel>], iteration_bounds = array<i64: 1>, scalar_prefetch = 0 : i64, scratch_operands = 0 : i64, tpu.core_type = #tpu.core_type<tc>, window_params = [{transform_indices = @transform_0, window_bounds = array<i64: 8, 256>}, {pipeline_mode = #tpu.pipeline_mode<synchronous>, transform_indices = @transform_1, window_bounds = array<i64: 8, 1>}, {pipeline_mode = #tpu.pipeline_mode<synchronous>, transform_indices = @transform_2, window_bounds = array<i64: 8, 1>}, {transform_indices = @transform_3, window_bounds = array<i64: 8, 256>}]} {
    %c8_i32 = arith.constant 8 : i32
    %0 = arith.muli %arg0, %c8_i32 : i32
    %1 = tpu.assume_multiple %0, 8 : i32
    %c0 = arith.constant 0 : index
    %c0_0 = arith.constant 0 : index
    %2 = vector.load %arg1[%c0, %c0_0] : memref<8x256xf32, #tpu.memory_space<vmem>>, vector<8x256xf32>
    %cst = arith.constant dense<0.000000e+00> : vector<8xf32>
    %3 = vector.multi_reduction <add>, %2, %cst [1] : vector<8x256xf32> to vector<8xf32>
    %4 = vector.shape_cast %3 : vector<8xf32> to vector<8x1xf32>
    %5 = arith.mulf %2, %2 : vector<8x256xf32>
    %cst_1 = arith.constant dense<0.000000e+00> : vector<8xf32>
    %6 = vector.multi_reduction <add>, %5, %cst_1 [1] : vector<8x256xf32> to vector<8xf32>
    %7 = vector.shape_cast %6 : vector<8xf32> to vector<8x1xf32>
    %cst_2 = arith.constant 3.906250e-03 : f32
    %8 = vector.broadcast %cst_2 : f32 to vector<8x1xf32>
    %9 = arith.mulf %4, %8 : vector<8x1xf32>
    %cst_3 = arith.constant 3.906250e-03 : f32
    %10 = vector.broadcast %cst_3 : f32 to vector<8x1xf32>
    %11 = arith.mulf %7, %10 : vector<8x1xf32>
    %12 = arith.mulf %9, %9 : vector<8x1xf32>
    %13 = arith.subf %11, %12 : vector<8x1xf32>
    %cst_4 = arith.constant 0.000000e+00 : f32
    %14 = vector.broadcast %cst_4 : f32 to vector<8x1xf32>
    %15 = arith.maximumf %13, %14 : vector<8x1xf32>
    %cst_5 = arith.constant 9.99999974E-6 : f32
    %16 = vector.broadcast %cst_5 : f32 to vector<8x1xf32>
    %17 = arith.addf %15, %16 : vector<8x1xf32>
    %18 = math.rsqrt %17 : vector<8x1xf32>
    %19 = arith.index_cast %1 : i32 to index
    %c0_6 = arith.constant 0 : index
    %20 = vector.load %arg2[%19, %c0_6] : memref<8x1xf32, #tpu.memory_space<vmem>>, vector<8x1xf32>
    %21 = arith.index_cast %1 : i32 to index
    %c0_7 = arith.constant 0 : index
    %22 = vector.load %arg3[%21, %c0_7] : memref<8x1xf32, #tpu.memory_space<vmem>>, vector<8x1xf32>
    %23 = arith.mulf %20, %18 : vector<8x1xf32>
    %24 = arith.mulf %9, %23 : vector<8x1xf32>
    %25 = arith.subf %22, %24 : vector<8x1xf32>
    %26 = vector.broadcast %23 : vector<8x1xf32> to vector<8x256xf32>
    %27 = arith.mulf %2, %26 : vector<8x256xf32>
    %28 = vector.broadcast %25 : vector<8x1xf32> to vector<8x256xf32>
    %29 = arith.addf %27, %28 : vector<8x256xf32>
    %c0_8 = arith.constant 0 : index
    %c0_9 = arith.constant 0 : index
    %30 = vector.load %arg4[%c0_8, %c0_9] : memref<8x256xf32, #tpu.memory_space<vmem>>, vector<8x256xf32>
    tpu.vector_store %arg4[%c0_8, %c0_9], %29 {strides = array<i32>} : memref<8x256xf32, #tpu.memory_space<vmem>>, vector<8x256xf32>,
    return
  }
  func.func @transform_0(%arg0: i32) -> (i32, i32) {
    %c0_i32 = arith.constant 0 : i32
    %c0_i32_0 = arith.constant 0 : i32
    return %arg0, %c0_i32 : i32, i32
  }
  func.func @transform_1(%arg0: i32) -> (i32, i32) {
    %c0_i32 = arith.constant 0 : i32
    %c0_i32_0 = arith.constant 0 : i32
    %c0_i32_1 = arith.constant 0 : i32
    return %c0_i32, %c0_i32_0 : i32, i32
  }
  func.func @transform_2(%arg0: i32) -> (i32, i32) {
    %c0_i32 = arith.constant 0 : i32
    %c0_i32_0 = arith.constant 0 : i32
    %c0_i32_1 = arith.constant 0 : i32
    return %c0_i32, %c0_i32_0 : i32, i32
  }
  func.func @transform_3(%arg0: i32) -> (i32, i32) {
    %c0_i32 = arith.constant 0 : i32
    %c0_i32_0 = arith.constant 0 : i32
    return %arg0, %c0_i32 : i32, i32
  }
}

</mosaic_0001>

<bundles_post_ra>
// kernel: tpu_custom_call.1
= control target key start
LH: loop header
LB: loop body
LE: loop exit
PB: predicated region body
PF: predicated region fallthrough
CT: control target
= control target key end

     0   :  { %s135_s0 = inlined_call_operand.vmem [shape: f32[8,256], index: 0, kind: input, shape index: {}]   ;;  %s136_s1 = inlined_call_operand.vmem [shape: f32[8,1], index: 1, kind: input, shape index: {}]   ;;  %s137_s2 = inlined_call_operand.vmem [shape: f32[8,1], index: 2, kind: input, shape index: {}]   ;;  %s138_s3 = inlined_call_operand.hbm [shape: f32[8,256], index: 3, kind: output, shape index: {}]  }
   0x1   :  { %v16_v0 = vld [vmem:[%s135_s0] sm:$0xff]  ;;  %v17_v1 = vld [vmem:[%s135_s0 + $0x8] sm:$0xff] }
   0x2   :  { %8 = vsyncpa [#allocation3], 0  ;;  %v18_v2 = vadd.f32 %v17_v1, %v16_v0  ;;  %v21_v3 = vmul.f32 %v16_v0, %v16_v0  ;;  %v22_v4 = vmul.f32 %v17_v1, %v17_v1  ;;  %v98_v6 = vmov 0   ;;  %v34_v15 = vld [vmem:[%s136_s1] sm:$0xff]  ;;  %s99_s19 = smov [#allocation2]  }
   0x3   :  { %72 = vset.pattern.permute.xlu1 %v98_v6  ;;  %73 = vset.pattern.permute.xlu0 %v98_v6  ;;  %v36_v18 = vld [vmem:[%s137_s2] sm:$0xff]  ;;  %s62_s20 = sshll.u32 %s99_s19, 4  ;;  %s63_s20 = int_to_ptr.vmem [resolvable:$true] %s62_s20 }
   0x4   :  { %19 = vadd.xlane.f32.xlu0 %v18_v2  ;;  %v23_v5 = vadd.f32 %v22_v4, %v21_v3  ;;  %s76_s1 = scalar_lea.vmem %s63_s20, 256  ;;  %p81_p1 = scmp.lt.s32.totalorder %s63_s20, %s63_s20 }
   0x5   :  { %p77_p0 = scmp.ne.s32.totalorder %s63_s20, %s76_s1  ;;  %p82_p2 = scmp.lt.s32.totalorder %s76_s1, %s76_s1 }
   0x7   :  { %p83_p3 = por %p82_p2, %p81_p1 }
   0x8   :  { %24 = vadd.xlane.f32.xlu0 %v23_v5 }
   0x9   :  { %p84_p4 = pnand %p83_p3, %p77_p0 }
  0x8d   :  { %v20_v7 = vpop.xlane.xlu0 %19 }
  0x8e   :  { %v26_v8 = vmul.f32 0.00390625, %v20_v7 }
  0x90   :  { %v28_v10 = vmul.f32 %v26_v8, %v26_v8 }
  0x91   :  { %v25_v9 = vpop.xlane.xlu0 %24 }
  0x92   :  { %v27_v11 = vmul.f32 0.00390625, %v25_v9 }
  0x94   :  { %v29_v12 = vsub.f32 %v27_v11, %v28_v10 }
  0x96   :  { %v30_v13 = vmax.f32 %v29_v12, 0.0 }
  0x98   :  { %v31_v14 = vadd.f32 1e-05, %v30_v13 }
  0x9a   :  { %74 = vrsqrt.f32 %v31_v14 }
  0xa7   :  { %v75_v16 = vpop.eup %74 }
  0xa8   :  { %v37_v17 = vmul.f32 %v75_v16, %v34_v15 }
  0xaa   :  { %42 = vperm.xlu1 %72, %v37_v17   ;;  %v38_v19 = vmul.f32 %v37_v17, %v26_v8 }
  0xac   :  { %v39_v20 = vsub.f32 %v36_v18, %v38_v19 }
  0xae   :  { %49 = vperm.xlu1 %72, %v39_v20  }
 0x125   :  { %v43_v21 = vpop.permute.xlu1 %42 }
 0x126   :  { %v45_v22 = vmul.f32 %v43_v21, %v16_v0  ;;  %v46_v23 = vmul.f32 %v43_v21, %v17_v1 }
 0x129   :  { %v50_v24 = vpop.permute.xlu1 %49 }
 0x12a   :  { %v52_v25 = vadd.f32 %v50_v24, %v45_v22  ;;  %v53_v26 = vadd.f32 %v50_v24, %v46_v23 }
 0x12c   :  { %54 = vst [vmem:[#allocation2] sm:$0xff] %v52_v25  ;;  %55 = vst [vmem:[#allocation2 + $0x8] sm:$0xff] %v53_v26 }
 0x12d   :  { %87 = shalt.err (!%p84_p4)
}
 0x12e   :  { %65 = dma.vmem_to_hbm [thread:$0]  %s63_s20, 256, %s138_s3, [#allocation3]  }
 0x12f   :  { %96 = dma.done.wait [#allocation3], 256  }
 0x130   :  { %97 = vsyncadd [#allocation3], 4294967040 }
 0x131   :  { %69 = vsyncpa [#allocation3], 1 }

</bundles_post_ra>
